<compile_context>
chip_gen: v6e
topology: v6e:2x2x1
jax: 0.10.0
libtpu: 0.0.40
codegen_flags: <defaults>
</compile_context>

<pallas_src>
import functools

import jax
import jax.numpy as jnp
from jax import lax
from jax.experimental import pallas as pl
from jax.experimental.pallas import tpu as pltpu


def _treelang_ce_kernel(h_ref, tgt_ref, eproj_ref, whh_t_ref, loss_ref, *,
                        temp, n_valid, block_rows):
    h = h_ref[...]            # (bR, nhid)       f32  context hiddens
    tgt = tgt_ref[...]        # (bR, 1)          i32  target word ids
    eproj = eproj_ref[...]    # (ntokens, nhid)  f32  E @ W_ih^T + bias (precomputed)
    whh_t = whh_t_ref[...]    # (nhid, nhid)     f32  W_hh^T (pre-transposed)

    # RNN one-step hidden projection of the context (MXU).
    hproj = jnp.dot(h, whh_t, preferred_element_type=jnp.float32)   # (bR, nhid)

    # Candidate next-hiddens for every token, vectorized over the token axis.
    hn = jnp.tanh(hproj[:, None, :] + eproj[None, :, :])            # (bR, ntokens, nhid)
    diff = h[:, None, :] - hn
    d2 = jnp.sum(diff * diff, axis=-1)                              # (bR, ntokens)
    logits = (-temp) * d2                                           # polynomial2 kernel

    # Cross entropy per row: logsumexp(logits) - logits[target].
    m = jnp.max(logits, axis=-1, keepdims=True)                     # (bR, 1)
    lse = m + jnp.log(jnp.sum(jnp.exp(logits - m), axis=-1, keepdims=True))
    onehot = lax.broadcasted_iota(jnp.int32, logits.shape, 1) == tgt
    tgt_logit = jnp.sum(jnp.where(onehot, logits, 0.0), axis=-1, keepdims=True)

    # Mask zero-padded rows; each grid step owns a distinct output block, so
    # there is no serial accumulator and the grid axis can be "parallel".
    row = (pl.program_id(0) * block_rows
           + lax.broadcasted_iota(jnp.int32, (block_rows, 1), 0))
    valid = row < n_valid
    loss_ref[...] = jnp.where(valid, lse - tgt_logit, 0.0)


def treelang_cross_entropy_loss(hiddens, targets, params, *, ntokens, temp,
                                block_rows=256):
    """hiddens: (seq_len, bsz, nhid) f32, targets: (seq_len, bsz) int32."""
    seq_len, bsz, nhid = hiddens.shape
    N = seq_len * bsz
    E, Wih, Whh, bias, decoder_w = params

    # Grid-invariant pieces hoisted out of the kernel (one XLA matmul/transpose).
    eproj = (E.astype(jnp.float32) @ Wih.astype(jnp.float32).T
             + bias.astype(jnp.float32))                            # (ntokens, nhid)
    whh_t = Whh.astype(jnp.float32).T                               # (nhid, nhid)

    n_pad = pl.cdiv(N, block_rows) * block_rows
    h_flat = hiddens.reshape(N, nhid).astype(jnp.float32)
    t_flat = targets.reshape(N, 1).astype(jnp.int32)
    h_flat = jnp.pad(h_flat, ((0, n_pad - N), (0, 0)))
    t_flat = jnp.pad(t_flat, ((0, n_pad - N), (0, 0)))

    grid = (n_pad // block_rows,)
    kernel = functools.partial(_treelang_ce_kernel, temp=float(temp),
                               n_valid=N, block_rows=block_rows)

    per_row = pl.pallas_call(
        kernel,
        out_shape=jax.ShapeDtypeStruct((n_pad, 1), jnp.float32),
        grid_spec=pltpu.PrefetchScalarGridSpec(
            num_scalar_prefetch=0,
            grid=grid,
            in_specs=[
                pl.BlockSpec((block_rows, nhid), lambda i: (i, 0)),   # hiddens
                pl.BlockSpec((block_rows, 1), lambda i: (i, 0)),      # targets
                pl.BlockSpec((ntokens, nhid), lambda i: (0, 0)),      # eproj
                pl.BlockSpec((nhid, nhid), lambda i: (0, 0)),         # W_hh^T
            ],
            out_specs=pl.BlockSpec((block_rows, 1), lambda i: (i, 0)),
        ),
        compiler_params=pltpu.CompilerParams(
            dimension_semantics=("parallel",)),
    )(h_flat, t_flat, eproj, whh_t)

    # sum_i mean_b CE / seq_len == mean over all N rows; `.type_as(decoder.weight)`.
    return (jnp.sum(per_row) / N).astype(decoder_w.dtype)


def _reference(hiddens, targets, params, *, ntokens, temp):
    seq_len, bsz, nhid = hiddens.shape
    E, Wih, Whh, bias, decoder_w = params
    h = hiddens.reshape(-1, nhid)                                  # (N, nhid)
    t = targets.reshape(-1)                                        # (N,)
    eproj = E @ Wih.T + bias                                       # (ntokens, nhid)
    hproj = h @ Whh.T                                              # (N, nhid)
    hn = jnp.tanh(hproj[:, None, :] + eproj[None, :, :])           # (N, ntokens, nhid)
    d2 = jnp.sum((h[:, None, :] - hn) ** 2, axis=-1)               # (N, ntokens)
    logits = -temp * d2
    lse = jax.scipy.special.logsumexp(logits, axis=-1)
    tgt_logit = jnp.take_along_axis(logits, t[:, None], axis=-1)[:, 0]
    return jnp.mean(lse - tgt_logit).astype(decoder_w.dtype)


if __name__ == "__main__":
    ntokens, temp = 8, 100.0
    seq_len, bsz, nhid = 8, 2, 32

    key = jax.random.PRNGKey(0)
    k_h, k_t, k_e, k_ih, k_hh, k_b, k_d = jax.random.split(key, 7)

    hiddens = 0.1 * jax.random.normal(k_h, (seq_len, bsz, nhid), jnp.float32)
    targets = jax.random.randint(k_t, (seq_len, bsz), 0, ntokens, jnp.int32)

    # Deterministic synthetic model parameters (single-layer tanh RNN LM).
    E = 0.1 * jax.random.normal(k_e, (ntokens, nhid), jnp.float32)
    Wih = 0.1 * jax.random.normal(k_ih, (nhid, nhid), jnp.float32)
    Whh = 0.1 * jax.random.normal(k_hh, (nhid, nhid), jnp.float32)
    bias = 0.01 * jax.random.normal(k_b, (1, nhid), jnp.float32)   # b_ih + b_hh
    decoder_w = 0.1 * jax.random.normal(k_d, (ntokens, nhid), jnp.float32)
    params = (E, Wih, Whh, bias, decoder_w)

    loss = treelang_cross_entropy_loss(hiddens, targets, params,
                                       ntokens=ntokens, temp=temp)
    loss = jax.block_until_ready(loss)

    ref = _reference(hiddens, targets, params, ntokens=ntokens, temp=temp)
    assert jnp.allclose(loss, ref, rtol=1e-5, atol=1e-5), (loss, ref)

    print("KERNEL_OK")
</pallas_src>

<mosaic_0001>
module attributes {stable_mosaic.version = 11 : i64} {
  func.func @_treelang_ce_kernel(%arg0: i32, %arg1: memref<256x32xf32, #tpu.memory_space<vmem>>, %arg2: memref<256x1xi32, #tpu.memory_space<vmem>>, %arg3: memref<8x32xf32, #tpu.memory_space<vmem>>, %arg4: memref<32x32xf32, #tpu.memory_space<vmem>>, %arg5: memref<256x1xf32, #tpu.memory_space<vmem>>) attributes {dimension_semantics = [#tpu.dimension_semantics<parallel>], iteration_bounds = array<i64: 1>, scalar_prefetch = 0 : i64, scratch_operands = 0 : i64, tpu.core_type = #tpu.core_type<tc>, window_params = [{transform_indices = @transform_0, window_bounds = array<i64: 256, 32>}, {transform_indices = @transform_1, window_bounds = array<i64: 256, 1>}, {pipeline_mode = #tpu.pipeline_mode<synchronous>, transform_indices = @transform_2, window_bounds = array<i64: 8, 32>}, {pipeline_mode = #tpu.pipeline_mode<synchronous>, transform_indices = @transform_3, window_bounds = array<i64: 32, 32>}, {transform_indices = @transform_4, window_bounds = array<i64: 256, 1>}]} {
    %c0 = arith.constant 0 : index
    %c0_0 = arith.constant 0 : index
    %0 = vector.load %arg1[%c0, %c0_0] : memref<256x32xf32, #tpu.memory_space<vmem>>, vector<256x32xf32>
    %c0_1 = arith.constant 0 : index
    %c0_2 = arith.constant 0 : index
    %1 = vector.load %arg2[%c0_1, %c0_2] : memref<256x1xi32, #tpu.memory_space<vmem>>, vector<256x1xi32>
    %c0_3 = arith.constant 0 : index
    %c0_4 = arith.constant 0 : index
    %2 = vector.load %arg3[%c0_3, %c0_4] : memref<8x32xf32, #tpu.memory_space<vmem>>, vector<8x32xf32>
    %c0_5 = arith.constant 0 : index
    %c0_6 = arith.constant 0 : index
    %3 = vector.load %arg4[%c0_5, %c0_6] : memref<32x32xf32, #tpu.memory_space<vmem>>, vector<32x32xf32>
    %cst = arith.constant dense<0.000000e+00> : vector<256x32xf32>
    %4 = tpu.matmul %0, %3, %cst {dimension_numbers = #tpu.dot_dimension_numbers<[1], [0], [0], [1], [0, 0, 1, 1], [], []>} : vector<256x32xf32>, vector<32x32xf32>, vector<256x32xf32> -> vector<256x32xf32>
    %5 = vector.shape_cast %4 : vector<256x32xf32> to vector<256x1x32xf32>
    %6 = vector.shape_cast %2 : vector<8x32xf32> to vector<1x8x32xf32>
    %7 = vector.broadcast %5 : vector<256x1x32xf32> to vector<256x8x32xf32>
    %8 = vector.broadcast %6 : vector<1x8x32xf32> to vector<256x8x32xf32>
    %9 = arith.addf %7, %8 : vector<256x8x32xf32>
    %10 = math.tanh %9 : vector<256x8x32xf32>
    %11 = vector.shape_cast %0 : vector<256x32xf32> to vector<256x1x32xf32>
    %12 = vector.broadcast %11 : vector<256x1x32xf32> to vector<256x8x32xf32>
    %13 = arith.subf %12, %10 : vector<256x8x32xf32>
    %14 = arith.mulf %13, %13 : vector<256x8x32xf32>
    %cst_7 = arith.constant dense<0.000000e+00> : vector<256x8xf32>
    %15 = vector.multi_reduction <add>, %14, %cst_7 [2] : vector<256x8x32xf32> to vector<256x8xf32>
    %cst_8 = arith.constant -1.000000e+02 : f32
    %16 = vector.broadcast %cst_8 : f32 to vector<256x8xf32>
    %17 = arith.mulf %16, %15 : vector<256x8xf32>
    %cst_9 = arith.constant dense<0xFF800000> : vector<256xf32>
    %18 = vector.multi_reduction <maximumf>, %17, %cst_9 [1] : vector<256x8xf32> to vector<256xf32>
    %19 = vector.shape_cast %18 : vector<256xf32> to vector<256x1xf32>
    %20 = vector.broadcast %19 : vector<256x1xf32> to vector<256x8xf32>
    %21 = arith.subf %17, %20 : vector<256x8xf32>
    %22 = math.exp %21 : vector<256x8xf32>
    %cst_10 = arith.constant dense<0.000000e+00> : vector<256xf32>
    %23 = vector.multi_reduction <add>, %22, %cst_10 [1] : vector<256x8xf32> to vector<256xf32>
    %24 = vector.shape_cast %23 : vector<256xf32> to vector<256x1xf32>
    %25 = math.log %24 : vector<256x1xf32>
    %26 = arith.addf %19, %25 : vector<256x1xf32>
    %27 = tpu.iota {dimensions = array<i32: 1>} : vector<256x8xi32>
    %28 = vector.broadcast %1 : vector<256x1xi32> to vector<256x8xi32>
    %29 = arith.cmpi eq, %27, %28 : vector<256x8xi32>
    %cst_11 = arith.constant 0.000000e+00 : f32
    %30 = vector.broadcast %cst_11 : f32 to vector<256x8xf32>
    %31 = arith.select %29, %17, %30 : vector<256x8xi1>, vector<256x8xf32>
    %cst_12 = arith.constant dense<0.000000e+00> : vector<256xf32>
    %32 = vector.multi_reduction <add>, %31, %cst_12 [1] : vector<256x8xf32> to vector<256xf32>
    %33 = vector.shape_cast %32 : vector<256xf32> to vector<256x1xf32>
    %c256_i32 = arith.constant 256 : i32
    %34 = arith.muli %arg0, %c256_i32 : i32
    %35 = tpu.iota {dimensions = array<i32: 0>} : vector<256x1xi32>
    %36 = vector.broadcast %34 : i32 to vector<256x1xi32>
    %37 = arith.addi %36, %35 : vector<256x1xi32>
    %c16_i32 = arith.constant 16 : i32
    %38 = vector.broadcast %c16_i32 : i32 to vector<256x1xi32>
    %39 = arith.cmpi slt, %37, %38 : vector<256x1xi32>
    %40 = arith.subf %26, %33 : vector<256x1xf32>
    %cst_13 = arith.constant 0.000000e+00 : f32
    %41 = vector.broadcast %cst_13 : f32 to vector<256x1xf32>
    %42 = arith.select %39, %40, %41 : vector<256x1xi1>, vector<256x1xf32>
    %c0_14 = arith.constant 0 : index
    %c0_15 = arith.constant 0 : index
    %43 = vector.load %arg5[%c0_14, %c0_15] : memref<256x1xf32, #tpu.memory_space<vmem>>, vector<256x1xf32>
    tpu.vector_store %arg5[%c0_14, %c0_15], %42 {strides = array<i32>} : memref<256x1xf32, #tpu.memory_space<vmem>>, vector<256x1xf32>,
    return
  }
  func.func @transform_0(%arg0: i32) -> (i32, i32) {
    %c0_i32 = arith.constant 0 : i32
    %c0_i32_0 = arith.constant 0 : i32
    return %arg0, %c0_i32 : i32, i32
  }
  func.func @transform_1(%arg0: i32) -> (i32, i32) {
    %c0_i32 = arith.constant 0 : i32
    %c0_i32_0 = arith.constant 0 : i32
    return %arg0, %c0_i32 : i32, i32
  }
  func.func @transform_2(%arg0: i32) -> (i32, i32) {
    %c0_i32 = arith.constant 0 : i32
    %c0_i32_0 = arith.constant 0 : i32
    %c0_i32_1 = arith.constant 0 : i32
    return %c0_i32, %c0_i32_0 : i32, i32
  }
  func.func @transform_3(%arg0: i32) -> (i32, i32) {
    %c0_i32 = arith.constant 0 : i32
    %c0_i32_0 = arith.constant 0 : i32
    %c0_i32_1 = arith.constant 0 : i32
    return %c0_i32, %c0_i32_0 : i32, i32
  }
  func.func @transform_4(%arg0: i32) -> (i32, i32) {
    %c0_i32 = arith.constant 0 : i32
    %c0_i32_0 = arith.constant 0 : i32
    return %arg0, %c0_i32 : i32, i32
  }
}

</mosaic_0001>

<bundles_post_ra>
// kernel: tpu_custom_call.1
= control target key start
LH: loop header
LB: loop body
LE: loop exit
PB: predicated region body
PF: predicated region fallthrough
CT: control target
= control target key end

     0   :  { %vm86_vm0 = vcmask 261120   ;;  %v15065_v6 = vmov 1966171168   ;;  %v444_v8 = vlaneseq  ;;  %vm9466_vm1 = vcmask 1041409   ;;  %s15696_s3 = inlined_call_operand.vmem [shape: f32[32,32], index: 3, kind: input, shape index: {}]   ;;  %s15697_s0 = inlined_call_operand.vmem [shape: f32[256,32], index: 0, kind: input, shape index: {}]   ;;  %s15698_s2 = inlined_call_operand.vmem [shape: f32[8,32], index: 2, kind: input, shape index: {}]   ;;  %s15699_s1 = inlined_call_operand.vmem [shape: s32[256,1], index: 1, kind: input, shape index: {}]   ;;  %s15700_s4 = inlined_call_operand.vmem [shape: f32[256,1], index: 4, kind: output, shape index: {}]  }
   0x1   :  { %v85_v0 = vld [vmem:[%s15696_s3 + $0x18] sm:$0xff]  ;;  %v84_v1 = vld [vmem:[%s15696_s3 + $0x10] sm:$0xff]  ;;  %v15102_v2 = vld [vmem:[%s15697_s0] sm:$0xff]  ;;  %v442_v7 = vunpack.c.l.s4 %v15065_v6  ;;  %vm9468_vm2 = vcmask 1042434   ;;  %vm9470_vm3 = vcmask 1043459   ;;  %vm9472_vm4 = vcmask 1044484  }
   0x2   :  { %14926 = vmatprep.subr.mxu0 %v85_v0  ;;  %14982 = vmatprep.subr.mxu1 %v85_v0  ;;  %v83_v3 = vld [vmem:[%s15696_s3 + $0x8] sm:$0xff]  ;;  %v82_v4 = vld [vmem:[%s15696_s3] sm:$0xff]  ;;  %v15120_v10 = vshrl.u32 %v444_v8, 7  ;;  %v3800_v46 = vcombine.high %v15102_v2, %v15102_v2  ;;  %vm9474_vm5 = vcmask 1045509   ;;  %vm9476_vm6 = vcmask 1046534  }
   0x3   :  { %14927 = vmatpush3.msra.mxu0 %v85_v0  ;;  %14934 = vmatprep.mubr.msk.f32.mxu0 %vm86_vm0, %v15102_v2  ;;  %v15115_v5 = vld [vmem:[%s15697_s0 + $0x8] sm:$0xff]  ;;  %v443_v9 = vunpack.c.0.s8 %v442_v7  ;;  %v15135_v21 = vld [vmem:[%s15698_s2] sm:$0xff]  ;;  %vm9478_vm7 = vcmask 1047559   ;;  %vm9729_vm8 = vcmask 64512   ;;  %vm14821_vm11 = vcmask 7168  }
   0x4   :  { %14928 = vmatprep.subr.mxu0 %v84_v1  ;;  %14986 = vmatpush3.msra.mxu1 %v85_v0  ;;  %v15127_v15 = vsub.s32 0, %v15120_v10  ;;  %v3849_v47 = vcombine.high %v15115_v5, %v15115_v5 }
   0x5   :  { %14929 = vmatpush3.msra.mxu0 %v84_v1  ;;  %14983 = vmatprep.subr.mxu1 %v84_v1  ;;  %v15123_v11 = vsub.s32 %v443_v9, %v15120_v10 }
   0x6   :  { %14930 = vmatprep.subr.mxu0 %v83_v3  ;;  %14987 = vmatpush3.msra.mxu1 %v84_v1 }
   0x7   :  { %14931 = vmatpush3.msra.mxu0 %v83_v3  ;;  %14984 = vmatprep.subr.mxu1 %v83_v3  ;;  %v3856_v34 = vrot.slane %v15115_v5, %v15123_v11  ;;  %v3807_v50 = vrot.slane %v15102_v2, %v15123_v11  ;;  %v3863_v61 = vrot.slane %v3849_v47, %v15123_v11 }
   0x8   :  { %14932 = vmatprep.subr.mxu0 %v82_v4  ;;  %14988 = vmatpush3.msra.mxu1 %v83_v3 }
   0x9   :  { %14933 = vmatpush3.msra.mxu0 %v82_v4  ;;  %14985 = vmatprep.subr.mxu1 %v82_v4  ;;  %v3864_v48 = vcombine.high %v3856_v34, %v3856_v34  ;;  %v3872_v53 = vrot.slane %v3856_v34, %v15123_v11  ;;  %v15177_v0 = vrot.slane %v3807_v50, %v15123_v11 }
   0xa   :  { %14935 = vmatmul.mubr.msk.f32.vlgmr.msra.gmra.mxu0 %vm86_vm0, %v15115_v5  ;;  %14989 = vmatpush3.msra.mxu1 %v82_v4 }
   0xb   :  { %v3886_v63 = vrot.slane %v3864_v48, %v15123_v11  ;;  %v5403_v2 = vrot.slane %v3872_v53, %v15127_v15  ;;  %v3894_v5 = vcombine.high %v3872_v53, %v3872_v53 }
  0xca   :  { %v14936_v12 = vpop.f32.mrf.mxu0 }
  0xcb   :  { %v489_v13 = vcombine.high %v14936_v12, %v14936_v12  ;;  %v496_v14 = vrot.slane %v14936_v12, %v15123_v11  ;;  %v3815_v12 = vcombine.high %v3807_v50, %v3807_v50 }
  0xcc   :  { %v249_v16 = vpop.f32.mrf.mxu0 }
  0xcd   :  { %v503_v17 = vrot.slane %v489_v13, %v15123_v11  ;;  %v504_v18 = vcombine.high %v496_v14, %v496_v14  ;;  %v512_v19 = vrot.slane %v496_v14, %v15123_v11  ;;  %v447_v20 = vrot.slane %v249_v16, %v15123_v11 }
  0xce   :  { %v440_v25 = vcombine.high %v249_v16, %v249_v16  ;;  %v5407_v13 = vrot.slane %v3886_v63, %v15127_v15  ;;  %v15187_v16 = vrot.slane %v3800_v46, %v15123_v11 }
  0xcf   :  { %v519_v22 = vrot.slane %v503_v17, %v15123_v11  ;;  %v526_v23 = vrot.slane %v504_v18, %v15123_v11  ;;  %v534_v24 = vcombine.high %v512_v19, %v512_v19  ;;  %v2043_v26 = vrot.slane %v512_v19, %v15127_v15 }
  0xd0   :  { %v505_v27 = vcombine.high %v503_v17, %v503_v17  ;;  %v455_v33 = vcombine.high %v447_v20, %v447_v20  ;;  %v454_v35 = vrot.slane %v440_v25, %v15123_v11  ;;  %v463_v36 = vrot.slane %v447_v20, %v15123_v11 }
  0xd1   :  { %v536_v28 = vcombine.high %v526_v23, %v526_v23  ;;  %v2047_v29 = vrot.slane %v526_v23, %v15127_v15  ;;  %v2051_v30 = vrot.slane %v534_v24, %v15127_v15  ;;  %v2059_v31 = vrot.slane %v519_v22, %v15127_v15 }
  0xd2   :  { %v3296_v32 = vadd.f32 %v2043_v26, %v15135_v21  ;;  %v533_v40 = vrot.slane %v505_v27, %v15123_v11  ;;  %v477_v42 = vrot.slane %v455_v33, %v15123_v11  ;;  %v15155_v43 = vrot.slane %v454_v35, %v15123_v11 }
  0xd3   :  { %v2055_v37 = vrot.slane %v536_v28, %v15127_v15  ;;  %v3297_v38 = vadd.f32 %v2047_v29, %v15135_v21  ;;  %v3298_v39 = vadd.f32 %v2051_v30, %v15135_v21  ;;  %v3300_v41 = vadd.f32 %v2059_v31, %v15135_v21 }
  0xd4   :  { %14997 = vtanh.f32 %v3296_v32  ;;  %v485_v44 = vcombine.high %v463_v36, %v463_v36  ;;  %v2011_v45 = vrot.slane %v463_v36, %v15127_v15  ;;  %v2015_v51 = vrot.slane %v477_v42, %v15127_v15 }
  0xd5   :  { %14999 = vtanh.f32 %v3297_v38  ;;  %v3299_v49 = vadd.f32 %v2055_v37, %v15135_v21  ;;  %v535_v54 = vcombine.high %v519_v22, %v519_v22  ;;  %v2063_v55 = vrot.slane %v533_v40, %v15127_v15 }
  0xd6   :  { %15001 = vtanh.f32 %v3298_v39  ;;  %v2019_v52 = vrot.slane %v485_v44, %v15127_v15  ;;  %v456_v56 = vcombine.high %v454_v35, %v454_v35  ;;  %v487_v57 = vcombine.high %v477_v42, %v477_v42 }
  0xd7   :  { %15003 = vtanh.f32 %v3300_v41  ;;  %v2027_v58 = vrot.slane %v15155_v43, %v15127_v15  ;;  %v3288_v59 = vadd.f32 %v2011_v45, %v15135_v21  ;;  %v3289_v60 = vadd.f32 %v2015_v51, %v15135_v21 }
  0xd8   :  { %15005 = vtanh.f32 %v3299_v49  ;;  %v3290_v62 = vadd.f32 %v2019_v52, %v15135_v21  ;;  %v537_v1 = vcombine.high %v533_v40, %v533_v40  ;;  %v2067_v3 = vrot.slane %v535_v54, %v15127_v15 }
  0xd9   :  { %15007 = vtanh.f32 %v3288_v59  ;;  %v3301_v4 = vadd.f32 %v2063_v55, %v15135_v21  ;;  %v484_v6 = vrot.slane %v456_v56, %v15123_v11  ;;  %v2023_v7 = vrot.slane %v487_v57, %v15127_v15 }
  0xda   :  { %15009 = vtanh.f32 %v3289_v60  ;;  %v3292_v9 = vadd.f32 %v2027_v58, %v15135_v21  ;;  %v2071_v17 = vrot.slane %v537_v1, %v15127_v15  ;;  %v5371_v18 = vrot.slane %v15177_v0, %v15127_v15 }
  0xdb   :  { %15011 = vtanh.f32 %v3290_v62  ;;  %v15193_v19 = vrot.slane %v3863_v61, %v15123_v11  ;;  %v3302_v20 = vadd.f32 %v2067_v3, %v15135_v21  ;;  %v5411_v23 = vrot.slane %v3894_v5, %v15127_v15 }
  0xdc   :  { %15013 = vtanh.f32 %v3301_v4  ;;  %v486_v25 = vcombine.high %v15155_v43, %v15155_v43  ;;  %v2031_v26 = vrot.slane %v484_v6, %v15127_v15  ;;  %v3291_v27 = vadd.f32 %v2023_v7, %v15135_v21 }
  0xdd   :  { %15015 = vtanh.f32 %v3292_v9  ;;  %v3837_v31 = vrot.slane %v3815_v12, %v15123_v11  ;;  %v3865_v32 = vcombine.high %v3863_v61, %v3863_v61  ;;  %v3303_v33 = vadd.f32 %v2071_v17, %v15135_v21 }
  0xde   :  { %v488_v34 = vcombine.high %v484_v6, %v484_v6  ;;  %v5419_v35 = vrot.slane %v15193_v19, %v15127_v15  ;;  %v3896_v36 = vcombine.high %v3886_v63, %v3886_v63  ;;  %15017 = vtanh.f32 %v3302_v20 }
  0xdf   :  { %v2035_v41 = vrot.slane %v486_v25, %v15127_v15  ;;  %v3293_v42 = vadd.f32 %v2031_v26, %v15135_v21  ;;  %15019 = vtanh.f32 %v3291_v27  ;;  %v3845_v43 = vcombine.high %v15177_v0, %v15177_v0 }
  0xe0   :  { %v5375_v44 = vrot.slane %v3837_v31, %v15127_v15  ;;  %v2039_v46 = vrot.slane %v488_v34, %v15127_v15  ;;  %v15214_v47 = vrot.slane %v15187_v16, %v15123_v11  ;;  %v5415_v48 = vrot.slane %v3896_v36, %v15127_v15 }
  0xe1   :  { %v14998_v14 = vpop.eup %14997  ;;  %v3893_v49 = vrot.slane %v3865_v32, %v15123_v11  ;;  %15021 = vtanh.f32 %v3303_v33  ;;  %v3294_v55 = vadd.f32 %v2035_v41, %v15135_v21  ;;  %v5379_v57 = vrot.slane %v3845_v43, %v15127_v15 }
  0xe2   :  { %v6656_v22 = vsub.f32 %v5403_v2, %v14998_v14  ;;  %v15000_v24 = vpop.eup %14999  ;;  %15023 = vtanh.f32 %v3293_v42  ;;  %v3816_v59 = vcombine.high %v15187_v16, %v15187_v16  ;;  %v3847_v61 = vcombine.high %v3837_v31, %v3837_v31 }
  0xe3   :  { %v15002_v28 = vpop.eup %15001  ;;  %v6657_v30 = vsub.f32 %v5407_v13, %v15000_v24  ;;  %v5387_v63 = vrot.slane %v15214_v47, %v15127_v15  ;;  %v5423_v0 = vrot.slane %v3893_v49, %v15127_v15  ;;  %v3895_v1 = vcombine.high %v15193_v19, %v15193_v19 }
  0xe4   :  { %v6912_v29 = vmul.f32 %v6656_v22, %v6656_v22  ;;  %v6658_v39 = vsub.f32 %v5411_v23, %v15002_v28  ;;  %v15004_v40 = vpop.eup %15003  ;;  %v3295_v2 = vadd.f32 %v2039_v46, %v15135_v21  ;;  %15025 = vtanh.f32 %v3294_v55 }
  0xe5   :  { %v6913_v38 = vmul.f32 %v6657_v30, %v6657_v30  ;;  %v15006_v45 = vpop.eup %15005  ;;  %v6660_v53 = vsub.f32 %v5419_v35, %v15004_v40  ;;  %v5383_v14 = vrot.slane %v3847_v61, %v15127_v15  ;;  %v3844_v16 = vrot.slane %v3816_v59, %v15123_v11 }
  0xe6   :  { %v7184_v37 = vsel %vm86_vm0, %v6912_v29, 0.0  ;;  %v15008_v50 = vpop.eup %15007  ;;  %v6914_v52 = vmul.f32 %v6658_v39, %v6658_v39  ;;  %v6659_v5 = vsub.f32 %v5415_v48, %v15006_v45  ;;  %v3897_v17 = vcombine.high %v3893_v49, %v3893_v49 }
  0xe7   :  { %7185 = vadd.xlane.f32.xlu1 %v7184_v37  ;;  %v7187_v51 = vsel %vm86_vm0, %v6913_v38, 0.0  ;;  %v15010_v54 = vpop.eup %15009  ;;  %v6648_v56 = vsub.f32 %v5371_v18, %v15008_v50  ;;  %v6916_v4 = vmul.f32 %v6660_v53, %v6660_v53  ;;  %v5427_v20 = vrot.slane %v3895_v1, %v15127_v15 }
  0xe8   :  { %v15012_v58 = vpop.eup %15011  ;;  %v6649_v60 = vsub.f32 %v5375_v44, %v15010_v54  ;;  %v7190_v3 = vsel %vm86_vm0, %v6914_v52, 0.0  ;;  %v6915_v18 = vmul.f32 %v6659_v5, %v6659_v5  ;;  %15027 = vtanh.f32 %v3295_v2 }
  0xe9   :  { %v6904_v62 = vmul.f32 %v6648_v56, %v6648_v56  ;;  %v15014_v6 = vpop.eup %15013  ;;  %v6650_v12 = vsub.f32 %v5379_v57, %v15012_v58  ;;  %v7196_v21 = vsel %vm86_vm0, %v6916_v4, 0.0  ;;  %v5391_v27 = vrot.slane %v3844_v16, %v15127_v15 }
  0xea   :  { %v6905_v9 = vmul.f32 %v6649_v60, %v6649_v60  ;;  %v15016_v13 = vpop.eup %15015  ;;  %v6661_v19 = vsub.f32 %v5423_v0, %v15014_v6  ;;  %v7193_v11 = vsel %vm86_vm0, %v6915_v18, 0.0  ;;  %v5431_v30 = vrot.slane %v3897_v17, %v15127_v15 }
  0xeb   :  { %7188 = vadd.xlane.f32.xlu1 %v7187_v51  ;;  %v7160_v7 = vsel %vm86_vm0, %v6904_v62, 0.0  ;;  %v15018_v22 = vpop.eup %15017  ;;  %v6906_v24 = vmul.f32 %v6650_v12, %v6650_v12  ;;  %v6652_v25 = vsub.f32 %v5387_v63, %v15016_v13  ;;  %v3846_v35 = vcombine.high %v15214_v47, %v15214_v47 }
  0xec   :  { %7161 = vadd.xlane.f32.xlu0 %v7160_v7  ;;  %v7163_v23 = vsel %vm86_vm0, %v6905_v9, 0.0  ;;  %v15020_v26 = vpop.eup %15019  ;;  %v6917_v28 = vmul.f32 %v6661_v19, %v6661_v19  ;;  %v6662_v29 = vsub.f32 %v5427_v20, %v15018_v22  ;;  %v3848_v40 = vcombine.high %v3844_v16, %v3844_v16 }
  0xed   :  { %v7166_v32 = vsel %vm86_vm0, %v6906_v24, 0.0  ;;  %v6908_v33 = vmul.f32 %v6652_v25, %v6652_v25  ;;  %v6651_v34 = vsub.f32 %v5383_v14, %v15020_v26  ;;  %v5395_v44 = vrot.slane %v3846_v35, %v15127_v15 }
  0xee   :  { %v15022_v31 = vpop.eup %15021  ;;  %v7199_v37 = vsel %vm86_vm0, %v6917_v28, 0.0  ;;  %v6918_v38 = vmul.f32 %v6662_v29, %v6662_v29  ;;  %v5399_v51 = vrot.slane %v3848_v40, %v15127_v15  ;;  %v15253_v2 = vand.u32 127, %v444_v8 }
  0xef   :  { %7191 = vadd.xlane.f32.xlu1 %v7190_v3  ;;  %v15024_v36 = vpop.eup %15023  ;;  %v6663_v39 = vsub.f32 %v5431_v30, %v15022_v31  ;;  %v7172_v41 = vsel %vm86_vm0, %v6908_v33, 0.0  ;;  %v6907_v42 = vmul.f32 %v6651_v34, %v6651_v34 }
  0xf0   :  { %7164 = vadd.xlane.f32.xlu0 %v7163_v23  ;;  %v6653_v43 = vsub.f32 %v5391_v27, %v15024_v36  ;;  %v7202_v46 = vsel %vm86_vm0, %v6918_v38, 0.0  ;;  %v15261_v7 = vsub.s32 %v15253_v2, %v15120_v10 }
  0xf1   :  { %v15026_v45 = vpop.eup %15025  ;;  %v6919_v48 = vmul.f32 %v6663_v39, %v6663_v39  ;;  %v7169_v47 = vsel %vm86_vm0, %v6907_v42, 0.0 }
  0xf2   :  { %v6909_v49 = vmul.f32 %v6653_v43, %v6653_v43  ;;  %v6654_v50 = vsub.f32 %v5395_v44, %v15026_v45 }
  0xf3   :  { %7197 = vadd.xlane.f32.xlu1 %v7196_v21  ;;  %v7205_v53 = vsel %vm86_vm0, %v6919_v48, 0.0 }
  0xf4   :  { %7167 = vadd.xlane.f32.xlu0 %v7166_v32  ;;  %v7175_v54 = vsel %vm86_vm0, %v6909_v49, 0.0  ;;  %v6910_v55 = vmul.f32 %v6654_v50, %v6654_v50 }
  0xf5   :  { %v15028_v52 = vpop.eup %15027 }
  0xf6   :  { %v6655_v56 = vsub.f32 %v5399_v51, %v15028_v52  ;;  %v7178_v57 = vsel %vm86_vm0, %v6910_v55, 0.0 }
  0xf7   :  { %7194 = vadd.xlane.f32.xlu1 %v7193_v11 }
  0xf8   :  { %7173 = vadd.xlane.f32.xlu0 %v7172_v41  ;;  %v6911_v58 = vmul.f32 %v6655_v56, %v6655_v56 }
  0xfa   :  { %v7181_v59 = vsel %vm86_vm0, %v6911_v58, 0.0 }
  0xfb   :  { %7200 = vadd.xlane.f32.xlu1 %v7199_v37 }
  0xfc   :  { %7170 = vadd.xlane.f32.xlu0 %v7169_v47 }
  0xff   :  { %7203 = vadd.xlane.f32.xlu1 %v7202_v46 }
 0x100   :  { %7176 = vadd.xlane.f32.xlu0 %v7175_v54 }
 0x103   :  { %7206 = vadd.xlane.f32.xlu1 %v7205_v53 }
 0x104   :  { %7179 = vadd.xlane.f32.xlu0 %v7178_v57 }
 0x108   :  { %7182 = vadd.xlane.f32.xlu0 %v7181_v59 }
 0x170   :  { %v7186_v60 = vpop.xlane.xlu1 %7185 }
 0x171   :  { %v15263_v9 = vmul.f32 -100.0, %v7186_v60 }
 0x173   :  { %v8477_v17 = vrot.slane %v15263_v9, %v15261_v7 }
 0x174   :  { %v7189_v61 = vpop.xlane.xlu1 %7188 }
 0x175   :  { %v7162_v63 = vpop.xlane.xlu0 %7161  ;;  %v15255_v4 = vmul.f32 -100.0, %v7189_v61 }
 0x176   :  { %v15290_v29 = vmul.f32 -100.0, %v7162_v63 }
 0x177   :  { %v8481_v14 = vrot.slane %v15255_v4, %v15261_v7 }
 0x178   :  { %v7192_v62 = vpop.xlane.xlu1 %7191  ;;  %v8445_v41 = vrot.slane %v15290_v29, %v15261_v7 }
 0x179   :  { %v7165_v1 = vpop.xlane.xlu0 %7164  ;;  %v15257_v6 = vmul.f32 -100.0, %v7192_v62  ;;  %v9480_v22 = vsel %vm9466_vm1, %v8481_v14, %v8477_v17  ;;  %v20_v14 = vld [vmem:[%s15697_s0 + $0x18] sm:$0xff]  ;;  %v22_v17 = vld [vmem:[%s15697_s0 + $0x28] sm:$0xff] }
 0x17a   :  { %v15282_v25 = vmul.f32 -100.0, %v7165_v1  ;;  %v33_v1 = vld [vmem:[%s15697_s0 + $0x80] sm:$0xff] }
 0x17b   :  { %v8485_v16 = vrot.slane %v15257_v6, %v15261_v7  ;;  %14958 = vmatprep.mubr.msk.f32.mxu1 %vm86_vm0, %v33_v1 }
 0x17c   :  { %v7198_v0 = vpop.xlane.xlu1 %7197  ;;  %v8449_v36 = vrot.slane %v15282_v25, %v15261_v7 }
 0x17d   :  { %v7168_v5 = vpop.xlane.xlu0 %7167  ;;  %v15277_v19 = vmul.f32 -100.0, %v7198_v0  ;;  %v9481_v26 = vsel %vm9468_vm2, %v8485_v16, %v9480_v22  ;;  %v15066_v0 = vmov 0   ;;  %v36_v16 = vld [vmem:[%s15697_s0 + $0x98] sm:$0xff]  ;;  %v38_v22 = vld [vmem:[%s15697_s0 + $0xa8] sm:$0xff] }
 0x17e   :  { %v15285_v27 = vmul.f32 -100.0, %v7168_v5  ;;  %v9467_v47 = vsel %vm9466_vm1, %v8449_v36, %v8445_v41  ;;  %14994 = vset.pattern.permute.xlu0 %v15066_v0  ;;  %14993 = vset.pattern.permute.xlu1 %v15066_v0  ;;  %v19_v5 = vld [vmem:[%s15697_s0 + $0x10] sm:$0xff]  ;;  %v28_v36 = vld [vmem:[%s15697_s0 + $0x58] sm:$0xff]  ;;  %v9876_v41 = vsub.s32 4, %v15120_v10 }
 0x17f   :  { %v8493_v30 = vrot.slane %v15277_v19, %v15261_v7  ;;  %14937 = vmatprep.mubr.msk.f32.mxu0 %vm86_vm0, %v19_v5 }
 0x180   :  { %v7195_v3 = vpop.xlane.xlu1 %7194  ;;  %v8453_v38 = vrot.slane %v15285_v27, %v15261_v7  ;;  %14938 = vmatmul.mubr.msk.f32.gmra.mxu0 %vm86_vm0, %v20_v14 }
 0x181   :  { %v15265_v12 = vmul.f32 -100.0, %v7195_v3  ;;  %v7174_v8 = vpop.xlane.xlu0 %7173  ;;  %v34_v3 = vld [vmem:[%s15697_s0 + $0x88] sm:$0xff] }
 0x182   :  { %v15315_v45 = vmul.f32 -100.0, %v7174_v8  ;;  %v9469_v51 = vsel %vm9468_vm2, %v8453_v38, %v9467_v47  ;;  %14959 = vmatmul.mubr.msk.f32.vlgmr.msra.gmra.mxu1 %vm86_vm0, %v34_v3  ;;  %v21_v8 = vld [vmem:[%s15697_s0 + $0x20] sm:$0xff]  ;;  %v44_v38 = vld [vmem:[%s15697_s0 + $0xd8] sm:$0xff]  ;;  %v9888_v3 = vsub.s32 7, %v15120_v10 }
 0x183   :  { %v8489_v21 = vrot.slane %v15265_v12, %v15261_v7  ;;  %14940 = vmatprep.mubr.msk.f32.mxu0 %vm86_vm0, %v21_v8 }
 0x184   :  { %v7201_v13 = vpop.xlane.xlu1 %7200  ;;  %v8461_v54 = vrot.slane %v15315_v45, %v15261_v7  ;;  %14941 = vmatmul.mubr.msk.f32.gmra.mxu0 %vm86_vm0, %v22_v17 }
 0x185   :  { %v15275_v18 = vmul.f32 -100.0, %v7201_v13  ;;  %v7171_v23 = vpop.xlane.xlu0 %7170  ;;  %v9482_v11 = vsel %vm9470_vm3, %v8489_v21, %v9481_v26  ;;  %v35_v13 = vld [vmem:[%s15697_s0 + $0x90] sm:$0xff]  ;;  %v37_v21 = vld [vmem:[%s15697_s0 + $0xa0] sm:$0xff] }
 0x186   :  { %v15294_v31 = vmul.f32 -100.0, %v7171_v23  ;;  %v9483_v37 = vsel %vm9472_vm4, %v8493_v30, %v9482_v11  ;;  %14961 = vmatprep.mubr.msk.f32.mxu1 %vm86_vm0, %v35_v13  ;;  %v24_v23 = vld [vmem:[%s15697_s0 + $0x38] sm:$0xff]  ;;  %v39_v26 = vld [vmem:[%s15697_s0 + $0xb0] sm:$0xff]  ;;  %v25_v11 = vld [vmem:[%s15697_s0 + $0x40] sm:$0xff] }
 0x187   :  { %v8497_v28 = vrot.slane %v15275_v18, %v15261_v7  ;;  %14962 = vmatmul.mubr.msk.f32.gmra.mxu1 %vm86_vm0, %v36_v16  ;;  %v26_v30 = vld [vmem:[%s15697_s0 + $0x48] sm:$0xff] }
 0x188   :  { %v7204_v20 = vpop.xlane.xlu1 %7203  ;;  %v8457_v42 = vrot.slane %v15294_v31, %v15261_v7  ;;  %14964 = vmatprep.mubr.msk.f32.mxu1 %vm86_vm0, %v37_v21 }
 0x189   :  { %v15280_v24 = vmul.f32 -100.0, %v7204_v20  ;;  %v7177_v34 = vpop.xlane.xlu0 %7176  ;;  %v9484_v40 = vsel %vm9474_vm5, %v8497_v28, %v9483_v37  ;;  %v23_v20 = vld [vmem:[%s15697_s0 + $0x30] sm:$0xff]  ;;  %v40_v28 = vld [vmem:[%s15697_s0 + $0xb8] sm:$0xff] }
 0x18a   :  { %v15312_v43 = vmul.f32 -100.0, %v7177_v34  ;;  %v9471_v52 = vsel %vm9470_vm3, %v8457_v42, %v9469_v51  ;;  %14943 = vmatprep.mubr.msk.f32.mxu0 %vm86_vm0, %v23_v20  ;;  %v42_v34 = vld [vmem:[%s15697_s0 + $0xc8] sm:$0xff]  ;;  %v43_v37 = vld [vmem:[%s15697_s0 + $0xd0] sm:$0xff]  ;;  %v9880_v42 = vsub.s32 5, %v15120_v10 }
 0x18b   :  { %v8501_v32 = vrot.slane %v15280_v24, %v15261_v7  ;;  %v9473_v58 = vsel %vm9472_vm4, %v8461_v54, %v9471_v52  ;;  %14965 = vmatmul.mubr.msk.f32.gmra.mxu1 %vm86_vm0, %v38_v22  ;;  %14944 = vmatmul.mubr.msk.f32.gmra.mxu0 %vm86_vm0, %v24_v23 }
 0x18c   :  { %v7207_v33 = vpop.xlane.xlu1 %7206  ;;  %v8465_v53 = vrot.slane %v15312_v43, %v15261_v7  ;;  %14967 = vmatprep.mubr.msk.f32.mxu1 %vm86_vm0, %v39_v26  ;;  %14946 = vmatprep.mubr.msk.f32.mxu0 %vm86_vm0, %v25_v11 }
 0x18d   :  { %v15298_v35 = vmul.f32 -100.0, %v7207_v33  ;;  %v9485_v44 = vsel %vm9476_vm6, %v8501_v32, %v9484_v40  ;;  %v7180_v46 = vpop.xlane.xlu0 %7179  ;;  %v41_v32 = vld [vmem:[%s15697_s0 + $0xc0] sm:$0xff]  ;;  %v27_v33 = vld [vmem:[%s15697_s0 + $0x50] sm:$0xff]  ;;  %v9868_v40 = vsub.s32 2, %v15120_v10 }
 0x18e   :  { %v15321_v49 = vmul.f32 -100.0, %v7180_v46  ;;  %v9475_v60 = vsel %vm9474_vm5, %v8465_v53, %v9473_v58  ;;  %v9884_v58 = vsub.s32 6, %v15120_v10 }
 0x18f   :  { %v8505_v39 = vrot.slane %v15298_v35, %v15261_v7  ;;  %14968 = vmatmul.mubr.msk.f32.gmra.mxu1 %vm86_vm0, %v40_v28  ;;  %14947 = vmatmul.mubr.msk.f32.gmra.mxu0 %vm86_vm0, %v26_v30 }
 0x190   :  { %v8469_v55 = vrot.slane %v15321_v49, %v15261_v7  ;;  %14970 = vmatprep.mubr.msk.f32.mxu1 %vm86_vm0, %v41_v32  ;;  %14949 = vmatprep.mubr.msk.f32.mxu0 %vm86_vm0, %v27_v33 }
 0x191   :  { %v15318_v48 = vsel %vm9478_vm7, %v8505_v39, %v9485_v44  ;;  %v7183_v56 = vpop.xlane.xlu0 %7182  ;;  %v9864_v39 = vsub.s32 1, %v15120_v10 }
 0x192   :  { %v9733_v50 = vsel %vm9729_vm8, %v15318_v48, -inf  ;;  %v15333_v57 = vmul.f32 -100.0, %v7183_v56  ;;  %v9477_v61 = vsel %vm9476_vm6, %v8469_v55, %v9475_v60 }
 0x193   :  { %9734 = vmax.xlane.f32.xlu1 %v9733_v50  ;;  %14971 = vmatmul.mubr.msk.f32.gmra.mxu1 %vm86_vm0, %v42_v34  ;;  %v9872_v50 = vsub.s32 3, %v15120_v10  ;;  %v50_v10 = vld [vmem:[%s15699_s1 + $0x8] sm:$0xff] }
 0x194   :  { %v8473_v59 = vrot.slane %v15333_v57, %v15261_v7  ;;  %14950 = vmatmul.mubr.msk.f32.gmra.mxu0 %vm86_vm0, %v28_v36  ;;  %14973 = vmatprep.mubr.msk.f32.mxu1 %vm86_vm0, %v43_v37  ;;  %v31_v37 = vld [vmem:[%s15697_s0 + $0x70] sm:$0xff] }
 0x196   :  { %v15341_v62 = vsel %vm9478_vm7, %v8473_v59, %v9477_v61 }
 0x197   :  { %v9730_v63 = vsel %vm9729_vm8, %v15341_v62, -inf  ;;  %14974 = vmatmul.mubr.msk.f32.gmra.mxu1 %vm86_vm0, %v44_v38  ;;  %v47_v38 = vld [vmem:[%s15697_s0 + $0xf0] sm:$0xff] }
 0x198   :  { %9731 = vmax.xlane.f32.xlu0 %v9730_v63 }
 0x21c   :  { %v15437_v44 = vpop.xlane.xlu1 %9734 }
 0x21d   :  { %v9893_v46 = vrot.slane %v15437_v44, %v15127_v15  ;;  %v9897_v47 = vrot.slane %v15437_v44, %v9864_v39  ;;  %v9901_v51 = vrot.slane %v15437_v44, %v9868_v40  ;;  %v9909_v52 = vrot.slane %v15437_v44, %v9876_v41 }
 0x21e   :  { %v9913_v53 = vrot.slane %v15437_v44, %v9880_v42  ;;  %v9905_v60 = vrot.slane %v15437_v44, %v9872_v50  ;;  %v9921_v8 = vrot.slane %v15437_v44, %v9888_v3 }
 0x21f   :  { %v11146_v54 = vsub.f32 %v15263_v9, %v9893_v46  ;;  %v11147_v55 = vsub.f32 %v15255_v4, %v9897_v47  ;;  %v11150_v56 = vsub.f32 %v15277_v19, %v9909_v52  ;;  %v11148_v61 = vsub.f32 %v15257_v6, %v9901_v51 }
 0x220   :  { %v11151_v0 = vsub.f32 %v15275_v18, %v9913_v53  ;;  %v9917_v4 = vrot.slane %v15437_v44, %v9884_v58  ;;  %v11149_v19 = vsub.f32 %v15265_v12, %v9905_v60  ;;  %v11153_v20 = vsub.f32 %v15298_v35, %v9921_v8  ;;  %v30_v35 = vld [vmem:[%s15697_s0 + $0x68] sm:$0xff] }
 0x221   :  { %v11410_v59 = vmul.f32 1.442695, %v11146_v54  ;;  %v11412_v63 = vmul.f32 1.442695, %v11147_v55  ;;  %v11418_v1 = vmul.f32 1.442695, %v11150_v56  ;;  %v15459_v9 = vpop.xlane.xlu0 %9731 }
 0x222   :  { %v11414_v5 = vmul.f32 1.442695, %v11148_v61  ;;  %v9861_v6 = vrot.slane %v15459_v9, %v15127_v15  ;;  %v11420_v13 = vmul.f32 1.442695, %v11151_v0  ;;  %v9865_v18 = vrot.slane %v15459_v9, %v9864_v39  ;;  %v48_v39 = vld [vmem:[%s15697_s0 + $0xf8] sm:$0xff] }
 0x223   :  { %15029 = vpow2.f32 %v11410_v59  ;;  %v11152_v16 = vsub.f32 %v15280_v24, %v9917_v4  ;;  %v11416_v17 = vmul.f32 1.442695, %v11149_v19  ;;  %v9869_v12 = vrot.slane %v15459_v9, %v9868_v40  ;;  %v29_v24 = vld [vmem:[%s15697_s0 + $0x60] sm:$0xff] }
 0x224   :  { %15031 = vpow2.f32 %v11412_v63  ;;  %v11138_v14 = vsub.f32 %v15290_v29, %v9861_v6  ;;  %v11139_v21 = vsub.f32 %v15282_v25, %v9865_v18  ;;  %v9873_v29 = vrot.slane %v15459_v9, %v9872_v50  ;;  %v45_v25 = vld [vmem:[%s15697_s0 + $0xe0] sm:$0xff]  ;;  %14952 = vmatprep.mubr.msk.f32.mxu0 %vm86_vm0, %v29_v24 }
 0x225   :  { %15033 = vpow2.f32 %v11418_v1  ;;  %v11422_v22 = vmul.f32 1.442695, %v11152_v16  ;;  %v11140_v23 = vsub.f32 %v15285_v27, %v9869_v12  ;;  %v11424_v28 = vmul.f32 1.442695, %v11153_v20  ;;  %14976 = vmatprep.mubr.msk.f32.mxu1 %vm86_vm0, %v45_v25  ;;  %v46_v27 = vld [vmem:[%s15697_s0 + $0xe8] sm:$0xff]  ;;  %14953 = vmatmul.mubr.msk.f32.gmra.mxu0 %vm86_vm0, %v30_v35  ;;  %v49_v19 = vld [vmem:[%s15699_s1] sm:$0xff] }
 0x226   :  { %15035 = vpow2.f32 %v11414_v5  ;;  %v11394_v15 = vmul.f32 1.442695, %v11138_v14  ;;  %v11396_v26 = vmul.f32 1.442695, %v11139_v21  ;;  %v9877_v32 = vrot.slane %v15459_v9, %v9876_v41  ;;  %14977 = vmatmul.mubr.msk.f32.gmra.mxu1 %vm86_vm0, %v46_v27  ;;  %14955 = vmatprep.mubr.msk.f32.mxu0 %vm86_vm0, %v31_v37 }
 0x227   :  { %15037 = vpow2.f32 %v11420_v13  ;;  %v11141_v33 = vsub.f32 %v15294_v31, %v9873_v29  ;;  %v11398_v34 = vmul.f32 1.442695, %v11140_v23  ;;  %v32_v31 = vld [vmem:[%s15697_s0 + $0x78] sm:$0xff]  ;;  %14979 = vmatprep.mubr.msk.f32.mxu1 %vm86_vm0, %v47_v38  ;;  %v9881_v41 = vrot.slane %v15459_v9, %v9880_v42 }
 0x228   :  { %15039 = vpow2.f32 %v11416_v17  ;;  %v11142_v46 = vsub.f32 %v15315_v45, %v9877_v32  ;;  %v9885_v52 = vrot.slane %v15459_v9, %v9884_v58  ;;  %v9889_v55 = vrot.slane %v15459_v9, %v9888_v3 }
 0x229   :  { %15041 = vpow2.f32 %v11394_v15  ;;  %v11400_v47 = vmul.f32 1.442695, %v11141_v33  ;;  %14956 = vmatmul.mubr.msk.f32.gmra.mxu0 %vm86_vm0, %v32_v31  ;;  %v11143_v53 = vsub.f32 %v15312_v43, %v9881_v41 }
 0x22a   :  { %15043 = vpow2.f32 %v11422_v22  ;;  %14980 = vmatmul.mubr.msk.f32.gmra.mxu1 %vm86_vm0, %v48_v39  ;;  %v11402_v42 = vmul.f32 1.442695, %v11142_v46  ;;  %v11144_v56 = vsub.f32 %v15321_v49, %v9885_v52  ;;  %v11145_v43 = vsub.f32 %v15333_v57, %v9889_v55 }
 0x22b   :  { %15045 = vpow2.f32 %v11396_v26  ;;  %v11404_v59 = vmul.f32 1.442695, %v11143_v53 }
 0x22c   :  { %15047 = vpow2.f32 %v11424_v28  ;;  %v11406_v61 = vmul.f32 1.442695, %v11144_v56  ;;  %v11408_v0 = vmul.f32 1.442695, %v11145_v43 }
 0x22d   :  { %15049 = vpow2.f32 %v11398_v34 }
 0x22e   :  { %15051 = vpow2.f32 %v11400_v47 }
 0x22f   :  { %15053 = vpow2.f32 %v11402_v42 }
 0x230   :  { %v15030_v11 = vpop.eup %15029  ;;  %15055 = vpow2.f32 %v11404_v59 }
 0x231   :  { %12187 = vperm.xlu1 %14993, %v15030_v11   ;;  %v15032_v30 = vpop.eup %15031  ;;  %15057 = vpow2.f32 %v11406_v61 }
 0x232   :  { %v15034_v36 = vpop.eup %15033  ;;  %15059 = vpow2.f32 %v11408_v0 }
 0x233   :  { %12199 = vperm.xlu0 %14994, %v15034_v36   ;;  %v15036_v40 = vpop.eup %15035 }
 0x234   :  { %v15038_v50 = vpop.eup %15037 }
 0x235   :  { %12190 = vperm.xlu1 %14993, %v15032_v30   ;;  %v15040_v51 = vpop.eup %15039 }
 0x236   :  { %v15042_v54 = vpop.eup %15041 }
 0x237   :  { %12202 = vperm.xlu0 %14994, %v15038_v50   ;;  %v15044_v45 = vpop.eup %15043 }
 0x238   :  { %v15046_v60 = vpop.eup %15045 }
 0x239   :  { %12193 = vperm.xlu1 %14993, %v15036_v40   ;;  %v15048_v58 = vpop.eup %15047 }
 0x23a   :  { %v15050_v63 = vpop.eup %15049 }
 0x23b   :  { %12163 = vperm.xlu0 %14994, %v15042_v54   ;;  %v15052_v49 = vpop.eup %15051 }
 0x23c   :  { %v15054_v1 = vpop.eup %15053 }
 0x23d   :  { %12196 = vperm.xlu1 %14993, %v15040_v51   ;;  %v15056_v3 = vpop.eup %15055 }
 0x23e   :  { %v15058_v57 = vpop.eup %15057 }
 0x23f   :  { %12205 = vperm.xlu0 %14994, %v15044_v45   ;;  %v15060_v4 = vpop.eup %15059 }
 0x240   :  { %v14939_v6 = vpop.f32.mrf.mxu0 }
 0x241   :  { %12166 = vperm.xlu1 %14993, %v15046_v60  }
 0x242   :  { %v14960_v5 = vpop.f32.mrf.mxu1  ;;  %v259_v18 = vpop.f32.mrf.mxu0 }
 0x243   :  { %12208 = vperm.xlu0 %14994, %v15048_v58  }
 0x244   :  { %v329_v13 = vpop.f32.mrf.mxu1  ;;  %v14942_v8 = vpop.f32.mrf.mxu0 }
 0x245   :  { %12169 = vperm.xlu1 %14993, %v15050_v63  }
 0x246   :  { %v269_v17 = vpop.f32.mrf.mxu0 }
 0x247   :  { %14406 = vperm.xlu0 %14994, %v50_v10   ;;  %v14963_v14 = vpop.f32.mrf.mxu1 }
 0x249   :  { %12172 = vperm.xlu1 %14993, %v15052_v49   ;;  %v339_v16 = vpop.f32.mrf.mxu1 }
 0x24b   :  { %v14966_v12 = vpop.f32.mrf.mxu1  ;;  %v14945_v21 = vpop.f32.mrf.mxu0 }
 0x24d   :  { %12175 = vperm.xlu1 %14993, %v15054_v1   ;;  %v349_v15 = vpop.f32.mrf.mxu1  ;;  %v279_v20 = vpop.f32.mrf.mxu0 }
 0x24f   :  { %v14969_v22 = vpop.f32.mrf.mxu1  ;;  %v14948_v29 = vpop.f32.mrf.mxu0 }
 0x251   :  { %12178 = vperm.xlu1 %14993, %v15056_v3   ;;  %v359_v26 = vpop.f32.mrf.mxu1  ;;  %v289_v11 = vpop.f32.mrf.mxu0 }
 0x253   :  { %v14972_v24 = vpop.f32.mrf.mxu1 }
 0x254   :  { %v14951_v25 = vpop.f32.mrf.mxu0 }
 0x255   :  { %12181 = vperm.xlu1 %14993, %v15058_v57   ;;  %v369_v27 = vpop.f32.mrf.mxu1 }
 0x256   :  { %v299_v30 = vpop.f32.mrf.mxu0 }
 0x257   :  { %v14975_v32 = vpop.f32.mrf.mxu1 }
 0x259   :  { %12184 = vperm.xlu1 %14993, %v15060_v4   ;;  %v379_v37 = vpop.f32.mrf.mxu1 }
 0x25d   :  { %14403 = vperm.xlu1 %14993, %v49_v19  }
 0x2ac   :  { %v12188_v23 = vpop.permute.xlu1 %12187 }
 0x2ad   :  { %v12965_v31 = vrot.slane %v12188_v23, %v15261_v7 }
 0x2ae   :  { %v12200_v35 = vpop.permute.xlu0 %12199 }
 0x2af   :  { %v12981_v47 = vrot.slane %v12200_v35, %v15261_v7  ;;  %v15067_v35 = vmov 0.0  }
 0x2b0   :  { %v12191_v28 = vpop.permute.xlu1 %12190  ;;  %14824 = vst.msk [vmem:[%s15700_s4 + $0x10] sm:$0xff] %vm14821_vm11, %v15067_v35  ;;  %14825 = vst.msk [vmem:[%s15700_s4 + $0x18] sm:$0xff] %vm14821_vm11, %v15067_v35 }
 0x2b1   :  { %v12969_v36 = vrot.slane %v12191_v28, %v15261_v7  ;;  %14826 = vst.msk [vmem:[%s15700_s4 + $0x20] sm:$0xff] %vm14821_vm11, %v15067_v35  ;;  %14827 = vst.msk [vmem:[%s15700_s4 + $0x28] sm:$0xff] %vm14821_vm11, %v15067_v35 }
 0x2b2   :  { %v12203_v33 = vpop.permute.xlu0 %12202  ;;  %14828 = vst.msk [vmem:[%s15700_s4 + $0x30] sm:$0xff] %vm14821_vm11, %v15067_v35  ;;  %14829 = vst.msk [vmem:[%s15700_s4 + $0x38] sm:$0xff] %vm14821_vm11, %v15067_v35 }
 0x2b3   :  { %v13961_v41 = vsel %vm9466_vm1, %v12969_v36, %v12965_v31  ;;  %v12985_v51 = vrot.slane %v12203_v33, %v15261_v7  ;;  %14830 = vst.msk [vmem:[%s15700_s4 + $0x40] sm:$0xff] %vm14821_vm11, %v15067_v35  ;;  %14831 = vst.msk [vmem:[%s15700_s4 + $0x48] sm:$0xff] %vm14821_vm11, %v15067_v35 }
 0x2b4   :  { %v12194_v34 = vpop.permute.xlu1 %12193  ;;  %14832 = vst.msk [vmem:[%s15700_s4 + $0x50] sm:$0xff] %vm14821_vm11, %v15067_v35  ;;  %14833 = vst.msk [vmem:[%s15700_s4 + $0x58] sm:$0xff] %vm14821_vm11, %v15067_v35 }
 0x2b5   :  { %v12973_v38 = vrot.slane %v12194_v34, %v15261_v7  ;;  %14834 = vst.msk [vmem:[%s15700_s4 + $0x60] sm:$0xff] %vm14821_vm11, %v15067_v35  ;;  %14835 = vst.msk [vmem:[%s15700_s4 + $0x68] sm:$0xff] %vm14821_vm11, %v15067_v35 }
 0x2b6   :  { %v12164_v39 = vpop.permute.xlu0 %12163  ;;  %14836 = vst.msk [vmem:[%s15700_s4 + $0x70] sm:$0xff] %vm14821_vm11, %v15067_v35  ;;  %14837 = vst.msk [vmem:[%s15700_s4 + $0x78] sm:$0xff] %vm14821_vm11, %v15067_v35 }
 0x2b7   :  { %v13962_v50 = vsel %vm9468_vm2, %v12973_v38, %v13961_v41  ;;  %v12933_v3 = vrot.slane %v12164_v39, %v15261_v7  ;;  %14838 = vst.msk [vmem:[%s15700_s4 + $0x80] sm:$0xff] %vm14821_vm11, %v15067_v35  ;;  %14839 = vst.msk [vmem:[%s15700_s4 + $0x88] sm:$0xff] %vm14821_vm11, %v15067_v35 }
 0x2b8   :  { %v12197_v40 = vpop.permute.xlu1 %12196  ;;  %14840 = vst.msk [vmem:[%s15700_s4 + $0x90] sm:$0xff] %vm14821_vm11, %v15067_v35  ;;  %14841 = vst.msk [vmem:[%s15700_s4 + $0x98] sm:$0xff] %vm14821_vm11, %v15067_v35 }
 0x2b9   :  { %v12977_v46 = vrot.slane %v12197_v40, %v15261_v7  ;;  %14842 = vst.msk [vmem:[%s15700_s4 + $0xa0] sm:$0xff] %vm14821_vm11, %v15067_v35  ;;  %14843 = vst.msk [vmem:[%s15700_s4 + $0xa8] sm:$0xff] %vm14821_vm11, %v15067_v35 }
 0x2ba   :  { %v12206_v42 = vpop.permute.xlu0 %12205  ;;  %14844 = vst.msk [vmem:[%s15700_s4 + $0xb0] sm:$0xff] %vm14821_vm11, %v15067_v35  ;;  %14845 = vst.msk [vmem:[%s15700_s4 + $0xb8] sm:$0xff] %vm14821_vm11, %v15067_v35 }
 0x2bb   :  { %v13963_v52 = vsel %vm9470_vm3, %v12977_v46, %v13962_v50  ;;  %v12989_v55 = vrot.slane %v12206_v42, %v15261_v7  ;;  %14846 = vst.msk [vmem:[%s15700_s4 + $0xc0] sm:$0xff] %vm14821_vm11, %v15067_v35  ;;  %14847 = vst.msk [vmem:[%s15700_s4 + $0xc8] sm:$0xff] %vm14821_vm11, %v15067_v35 }
 0x2bc   :  { %v13964_v53 = vsel %vm9472_vm4, %v12981_v47, %v13963_v52  ;;  %v12167_v54 = vpop.permute.xlu1 %12166  ;;  %14848 = vst.msk [vmem:[%s15700_s4 + $0xd0] sm:$0xff] %vm14821_vm11, %v15067_v35  ;;  %14849 = vst.msk [vmem:[%s15700_s4 + $0xd8] sm:$0xff] %vm14821_vm11, %v15067_v35 }
 0x2bd   :  { %v13965_v45 = vsel %vm9474_vm5, %v12985_v51, %v13964_v53  ;;  %v12937_v49 = vrot.slane %v12167_v54, %v15261_v7  ;;  %14850 = vst.msk [vmem:[%s15700_s4 + $0xe0] sm:$0xff] %vm14821_vm11, %v15067_v35  ;;  %14851 = vst.msk [vmem:[%s15700_s4 + $0xe8] sm:$0xff] %vm14821_vm11, %v15067_v35 }
 0x2be   :  { %v12209_v56 = vpop.permute.xlu0 %12208  ;;  %v13966_v60 = vsel %vm9476_vm6, %v12989_v55, %v13965_v45  ;;  %14852 = vst.msk [vmem:[%s15700_s4 + $0xf0] sm:$0xff] %vm14821_vm11, %v15067_v35  ;;  %14853 = vst.msk [vmem:[%s15700_s4 + $0xf8] sm:$0xff] %vm14821_vm11, %v15067_v35 }
 0x2bf   :  { %v12993_v58 = vrot.slane %v12209_v56, %v15261_v7  ;;  %v13954_v5 = vsel %vm9466_vm1, %v12937_v49, %v12933_v3 }
 0x2c0   :  { %v12170_v59 = vpop.permute.xlu1 %12169 }
 0x2c1   :  { %v13967_v43 = vsel %vm9478_vm7, %v12993_v58, %v13966_v60  ;;  %v12941_v1 = vrot.slane %v12170_v59, %v15261_v7 }
 0x2c2   :  { %v14213_v61 = vsel %vm9729_vm8, %v13967_v43, 0.0  ;;  %v14407_v14 = vpop.permute.xlu0 %14406 }
 0x2c3   :  { %14214 = vadd.xlane.f32.xlu0 %v14213_v61  ;;  %v13955_v13 = vsel %vm9468_vm2, %v12941_v1, %v13954_v5  ;;  %vm14499_vm9 = vcmp.eq.s32.totalorder %v15253_v2, %v14407_v14 }
 0x2c4   :  { %v12173_v63 = vpop.permute.xlu1 %12172  ;;  %v14531_v23 = vsel %vm14499_vm9, %v15318_v48, 0.0 }
 0x2c5   :  { %v12945_v57 = vrot.slane %v12173_v63, %v15261_v7 }
 0x2c7   :  { %v13956_v8 = vsel %vm9470_vm3, %v12945_v57, %v13955_v13 }
 0x2c8   :  { %v12176_v10 = vpop.permute.xlu1 %12175 }
 0x2c9   :  { %v12949_v4 = vrot.slane %v12176_v10, %v15261_v7 }
 0x2cb   :  { %v13957_v16 = vsel %vm9472_vm4, %v12949_v4, %v13956_v8 }
 0x2cc   :  { %v12179_v0 = vpop.permute.xlu1 %12178 }
 0x2cd   :  { %v12953_v6 = vrot.slane %v12179_v0, %v15261_v7 }
 0x2cf   :  { %v13958_v12 = vsel %vm9474_vm5, %v12953_v6, %v13957_v16 }
 0x2d0   :  { %v12182_v19 = vpop.permute.xlu1 %12181 }
 0x2d1   :  { %v12957_v18 = vrot.slane %v12182_v19, %v15261_v7 }
 0x2d3   :  { %v13959_v15 = vsel %vm9476_vm6, %v12957_v18, %v13958_v12 }
 0x2d4   :  { %v12185_v17 = vpop.permute.xlu1 %12184 }
 0x2d5   :  { %v12961_v21 = vrot.slane %v12185_v17, %v15261_v7  ;;  %v14565_v7 = vsel %vm9729_vm8, %v14531_v23, 0.0 }
 0x2d7   :  { %v13960_v20 = vsel %vm9478_vm7, %v12961_v21, %v13959_v15 }
 0x2d8   :  { %v14404_v22 = vpop.permute.xlu1 %14403  ;;  %v14210_v29 = vsel %vm9729_vm8, %v13960_v20, 0.0 }
 0x2d9   :  { %vm14498_vm10 = vcmp.eq.s32.totalorder %v15253_v2, %v14404_v22  ;;  %14211 = vadd.xlane.f32.xlu1 %v14210_v29 }
 0x2da   :  { %v14530_v26 = vsel %vm14498_vm10, %v15341_v62, 0.0 }
 0x2db   :  { %v14562_v11 = vsel %vm9729_vm8, %v14530_v26, 0.0 }
 0x2dc   :  { %14563 = vadd.xlane.f32.xlu0 %v14562_v11 }
 0x2dd   :  { %14566 = vadd.xlane.f32.xlu1 %v14565_v7 }
 0x2e5   :  { %v14954_v24 = vpop.f32.mrf.mxu0 }
 0x2e6   :  { %v14978_v25 = vpop.f32.mrf.mxu1 }
 0x2e7   :  { %v309_v2 = vpop.f32.mrf.mxu0 }
 0x2e8   :  { %v389_v48 = vpop.f32.mrf.mxu1 }
 0x2e9   :  { %v14957_v62 = vpop.f32.mrf.mxu0 }
 0x2ea   :  { %v14981_v28 = vpop.f32.mrf.mxu1 }
 0x2eb   :  { %v319_v27 = vpop.f32.mrf.mxu0 }
 0x2ec   :  { %v399_v30 = vpop.f32.mrf.mxu1 }
 0x34c   :  { %v14215_v32 = vpop.xlane.xlu0 %14214 }
 0x34d   :  { %15061 = vlog2.f32 %v14215_v32 }
 0x35a   :  { %v15062_v33 = vpop.eup %15061 }
 0x35b   :  { %v14309_v34 = vmul.f32 0.6931472, %v15062_v33 }
 0x35d   :  { %v14371_v37 = vadd.f32 %v14309_v34, %v15437_v44 }
 0x362   :  { %v14212_v36 = vpop.xlane.xlu1 %14211 }
 0x363   :  { %15063 = vlog2.f32 %v14212_v36 }
 0x365   :  { %v14564_v46 = vpop.xlane.xlu0 %14563 }
 0x366   :  { %v14567_v38 = vpop.xlane.xlu1 %14566 }
 0x367   :  { %v14758_v31 = vsub.f32 %v14371_v37, %v14567_v38 }
 0x369   :  { %14823 = vst.msk [vmem:[%s15700_s4 + $0x8] sm:$0xff] %vm14821_vm11, %v14758_v31 }
 0x370   :  { %v15064_v39 = vpop.eup %15063 }
 0x371   :  { %v14307_v40 = vmul.f32 0.6931472, %v15064_v39 }
 0x373   :  { %v14370_v41 = vadd.f32 %v14307_v40, %v15459_v9 }
 0x375   :  { %v14757_v47 = vsub.f32 %v14370_v41, %v14564_v46 }
 0x377   :  { %14822 = vst.msk [vmem:[%s15700_s4] sm:$0xff] %vm14821_vm11, %v14757_v47 }

</bundles_post_ra>
